<compile_context>
chip_gen: v6e
topology: v6e:2x2x1
jax: 0.10.0
libtpu: 0.0.40
codegen_flags: <defaults>
</compile_context>

<pallas_src>
import functools

import jax
import jax.numpy as jnp
from jax.experimental import pallas as pl
from jax.experimental.pallas import tpu as pltpu


def _outconv_kernel(w_ref, b_ref, x_ref, o_ref, *, c_in, c_out):
    # w_ref: (C_out, C_in) f32 scalars in SMEM
    # b_ref: (C_out,)      f32 scalars in SMEM
    # x_ref: (C_in, tm)    VMEM slab (one batch sample, tm spatial voxels)
    # o_ref: (C_out, tm)   VMEM slab
    x = x_ref[...].astype(jnp.float32)  # compute in f32 regardless of input dtype
    rows = []
    for co in range(c_out):             # c_out/c_in are tiny static ints: unroll
        acc = x[0:1, :] * w_ref[co, 0]
        for ci in range(1, c_in):
            acc = acc + x[ci:ci + 1, :] * w_ref[co, ci]
        rows.append(acc + b_ref[co])
    o_ref[...] = jnp.concatenate(rows, axis=0).astype(o_ref.dtype)


def _pick_tile_m(m_spatial, c_in, c_out, itemsize, slab_budget_bytes):
    """Largest lane-dense spatial tile whose double-buffered in+out slabs fit."""
    per_elem = 2 * (c_in + c_out) * itemsize      # double-buffered x + out slabs
    max_elems = max(128, slab_budget_bytes // per_elem)
    if m_spatial <= max_elems:
        return m_spatial                          # whole spatial extent per sample
    cap = max_elems - (max_elems % 128)           # keep last dim a multiple of 128
    if m_spatial % 128 == 0:
        # Prefer an exact divisor so there is no ragged tail at all.
        for cand in range(cap, 0, -128):
            if m_spatial % cand == 0:
                return cand
    # Ragged tail: Pallas pads OOB reads / drops OOB writes of the last block,
    # which is safe here because the op is elementwise over the spatial axis.
    return cap


def out_conv(x, weight, bias, *, slab_budget_bytes=16 * 1024 * 1024):
    """1x1x1 Conv3d forward.

    x:      (N, C_in, D, H, W)   NCDHW, matches PyTorch
    weight: (C_out, C_in, 1, 1, 1)
    bias:   (C_out,)
    returns (N, C_out, D, H, W)
    """
    n, c_in, d, h, w = x.shape
    c_out = weight.shape[0]
    m_spatial = d * h * w

    # Free views -- no transpose / extra copy of the activation tensor.
    x3d = x.reshape(n, c_in, m_spatial)
    w2d = weight.reshape(c_out, c_in).astype(jnp.float32)
    b1d = bias.reshape(c_out).astype(jnp.float32)

    itemsize = jnp.dtype(x.dtype).itemsize
    tm = _pick_tile_m(m_spatial, c_in, c_out, itemsize, slab_budget_bytes)
    grid_m = pl.cdiv(m_spatial, tm)

    bytes_accessed = (x3d.size + n * c_out * m_spatial) * itemsize + (w2d.size + b1d.size) * 4
    cost = pl.CostEstimate(
        flops=2 * n * m_spatial * c_in * c_out,
        transcendentals=0,
        bytes_accessed=bytes_accessed,
    )

    kernel = functools.partial(_outconv_kernel, c_in=c_in, c_out=c_out)

    y3d = pl.pallas_call(
        kernel,
        out_shape=jax.ShapeDtypeStruct((n, c_out, m_spatial), x.dtype),
        grid_spec=pltpu.PrefetchScalarGridSpec(
            num_scalar_prefetch=0,
            grid=(n, grid_m),
            in_specs=[
                pl.BlockSpec(memory_space=pltpu.MemorySpace.SMEM),      # weight
                pl.BlockSpec(memory_space=pltpu.MemorySpace.SMEM),      # bias
                pl.BlockSpec((None, c_in, tm), lambda b, i: (b, 0, i)),  # x slab
            ],
            out_specs=pl.BlockSpec((None, c_out, tm), lambda b, i: (b, 0, i)),
        ),
        compiler_params=pltpu.CompilerParams(
            dimension_semantics=("parallel", "parallel"),
            vmem_limit_bytes=48 * 1024 * 1024,   # within v7x's 64 MiB physical
        ),
        cost_estimate=cost,
    )(w2d, b1d, x3d)

    return y3d.reshape(n, c_out, d, h, w)


if __name__ == "__main__":
    # Small shapes consistent with the module (Conv3d -> 5-D NCDHW input).
    N, C_IN, C_OUT, D, H, W = 2, 4, 2, 8, 16, 16

    key = jax.random.PRNGKey(0)
    kx, kw, kb = jax.random.split(key, 3)

    x = jax.random.normal(kx, (N, C_IN, D, H, W), dtype=jnp.float32)

    # Deterministic init mirroring nn.Conv3d defaults: U(-1/sqrt(fan_in), +...)
    fan_in = C_IN * 1 * 1 * 1
    bound = 1.0 / (fan_in ** 0.5)
    weight = jax.random.uniform(
        kw, (C_OUT, C_IN, 1, 1, 1), minval=-bound, maxval=bound, dtype=jnp.float32
    )
    bias = jax.random.uniform(
        kb, (C_OUT,), minval=-bound, maxval=bound, dtype=jnp.float32
    )

    y = out_conv(x, weight, bias)
    y = jax.block_until_ready(y)

    # Pure-JAX reference check (1x1x1 conv == channel matmul + bias).
    y_ref = (
        jnp.einsum("oc,ncdhw->nodhw", weight.reshape(C_OUT, C_IN), x)
        + bias.reshape(1, C_OUT, 1, 1, 1)
    )
    assert y.shape == (N, C_OUT, D, H, W)
    assert jnp.allclose(y, y_ref, atol=1e-5, rtol=1e-5)

    print("KERNEL_OK")
</pallas_src>

<mosaic_0001>
module attributes {stable_mosaic.version = 11 : i64} {
  func.func @_outconv_kernel(%arg0: i32, %arg1: i32, %arg2: memref<2x4xf32, #tpu.memory_space<smem>>, %arg3: memref<2xf32, #tpu.memory_space<smem>>, %arg4: memref<1x4x2048xf32, #tpu.memory_space<vmem>>, %arg5: memref<1x2x2048xf32, #tpu.memory_space<vmem>>) attributes {dimension_semantics = [#tpu.dimension_semantics<parallel>, #tpu.dimension_semantics<parallel>], iteration_bounds = array<i64: 2, 1>, scalar_prefetch = 0 : i64, scratch_operands = 0 : i64, tpu.core_type = #tpu.core_type<tc>, window_params = [{transform_indices = @transform_0, window_bounds = array<i64: 2, 4>}, {transform_indices = @transform_1, window_bounds = array<i64: 2>}, {transform_indices = @transform_2, window_bounds = array<i64: 1, 4, 2048>}, {transform_indices = @transform_3, window_bounds = array<i64: 1, 2, 2048>}]} {
    %c0 = arith.constant 0 : index
    %c0_0 = arith.constant 0 : index
    %c0_1 = arith.constant 0 : index
    %0 = vector.load %arg4[%c0, %c0_0, %c0_1] : memref<1x4x2048xf32, #tpu.memory_space<vmem>>, vector<1x4x2048xf32>
    %1 = vector.shape_cast %0 : vector<1x4x2048xf32> to vector<4x2048xf32>
    %2 = vector.extract_strided_slice %1 {offsets = [0, 0], sizes = [1, 2048], strides = [1, 1]} : vector<4x2048xf32> to vector<1x2048xf32>
    %c0_2 = arith.constant 0 : index
    %c0_3 = arith.constant 0 : index
    %3 = memref.load %arg2[%c0_2, %c0_3] : memref<2x4xf32, #tpu.memory_space<smem>>
    %4 = vector.broadcast %3 : f32 to vector<1x2048xf32>
    %5 = arith.mulf %2, %4 : vector<1x2048xf32>
    %6 = vector.extract_strided_slice %1 {offsets = [1, 0], sizes = [1, 2048], strides = [1, 1]} : vector<4x2048xf32> to vector<1x2048xf32>
    %c0_4 = arith.constant 0 : index
    %c1 = arith.constant 1 : index
    %7 = memref.load %arg2[%c0_4, %c1] : memref<2x4xf32, #tpu.memory_space<smem>>
    %8 = vector.broadcast %7 : f32 to vector<1x2048xf32>
    %9 = arith.mulf %6, %8 : vector<1x2048xf32>
    %10 = arith.addf %5, %9 : vector<1x2048xf32>
    %11 = vector.extract_strided_slice %1 {offsets = [2, 0], sizes = [1, 2048], strides = [1, 1]} : vector<4x2048xf32> to vector<1x2048xf32>
    %c0_5 = arith.constant 0 : index
    %c2 = arith.constant 2 : index
    %12 = memref.load %arg2[%c0_5, %c2] : memref<2x4xf32, #tpu.memory_space<smem>>
    %13 = vector.broadcast %12 : f32 to vector<1x2048xf32>
    %14 = arith.mulf %11, %13 : vector<1x2048xf32>
    %15 = arith.addf %10, %14 : vector<1x2048xf32>
    %16 = vector.extract_strided_slice %1 {offsets = [3, 0], sizes = [1, 2048], strides = [1, 1]} : vector<4x2048xf32> to vector<1x2048xf32>
    %c0_6 = arith.constant 0 : index
    %c3 = arith.constant 3 : index
    %17 = memref.load %arg2[%c0_6, %c3] : memref<2x4xf32, #tpu.memory_space<smem>>
    %18 = vector.broadcast %17 : f32 to vector<1x2048xf32>
    %19 = arith.mulf %16, %18 : vector<1x2048xf32>
    %20 = arith.addf %15, %19 : vector<1x2048xf32>
    %c0_7 = arith.constant 0 : index
    %21 = memref.load %arg3[%c0_7] : memref<2xf32, #tpu.memory_space<smem>>
    %22 = vector.broadcast %21 : f32 to vector<1x2048xf32>
    %23 = arith.addf %20, %22 : vector<1x2048xf32>
    %24 = vector.extract_strided_slice %1 {offsets = [0, 0], sizes = [1, 2048], strides = [1, 1]} : vector<4x2048xf32> to vector<1x2048xf32>
    %c1_8 = arith.constant 1 : index
    %c0_9 = arith.constant 0 : index
    %25 = memref.load %arg2[%c1_8, %c0_9] : memref<2x4xf32, #tpu.memory_space<smem>>
    %26 = vector.broadcast %25 : f32 to vector<1x2048xf32>
    %27 = arith.mulf %24, %26 : vector<1x2048xf32>
    %28 = vector.extract_strided_slice %1 {offsets = [1, 0], sizes = [1, 2048], strides = [1, 1]} : vector<4x2048xf32> to vector<1x2048xf32>
    %c1_10 = arith.constant 1 : index
    %c1_11 = arith.constant 1 : index
    %29 = memref.load %arg2[%c1_10, %c1_11] : memref<2x4xf32, #tpu.memory_space<smem>>
    %30 = vector.broadcast %29 : f32 to vector<1x2048xf32>
    %31 = arith.mulf %28, %30 : vector<1x2048xf32>
    %32 = arith.addf %27, %31 : vector<1x2048xf32>
    %33 = vector.extract_strided_slice %1 {offsets = [2, 0], sizes = [1, 2048], strides = [1, 1]} : vector<4x2048xf32> to vector<1x2048xf32>
    %c1_12 = arith.constant 1 : index
    %c2_13 = arith.constant 2 : index
    %34 = memref.load %arg2[%c1_12, %c2_13] : memref<2x4xf32, #tpu.memory_space<smem>>
    %35 = vector.broadcast %34 : f32 to vector<1x2048xf32>
    %36 = arith.mulf %33, %35 : vector<1x2048xf32>
    %37 = arith.addf %32, %36 : vector<1x2048xf32>
    %38 = vector.extract_strided_slice %1 {offsets = [3, 0], sizes = [1, 2048], strides = [1, 1]} : vector<4x2048xf32> to vector<1x2048xf32>
    %c1_14 = arith.constant 1 : index
    %c3_15 = arith.constant 3 : index
    %39 = memref.load %arg2[%c1_14, %c3_15] : memref<2x4xf32, #tpu.memory_space<smem>>
    %40 = vector.broadcast %39 : f32 to vector<1x2048xf32>
    %41 = arith.mulf %38, %40 : vector<1x2048xf32>
    %42 = arith.addf %37, %41 : vector<1x2048xf32>
    %c1_16 = arith.constant 1 : index
    %43 = memref.load %arg3[%c1_16] : memref<2xf32, #tpu.memory_space<smem>>
    %44 = vector.broadcast %43 : f32 to vector<1x2048xf32>
    %45 = arith.addf %42, %44 : vector<1x2048xf32>
    %46 = tpu.concatenate %23, %45 in 0 : vector<1x2048xf32>, vector<1x2048xf32> -> vector<2x2048xf32>
    %c0_17 = arith.constant 0 : index
    %c0_18 = arith.constant 0 : index
    %c0_19 = arith.constant 0 : index
    %47 = vector.load %arg5[%c0_17, %c0_18, %c0_19] : memref<1x2x2048xf32, #tpu.memory_space<vmem>>, vector<1x2x2048xf32>
    %48 = vector.shape_cast %47 : vector<1x2x2048xf32> to vector<2x2048xf32>
    %49 = vector.shape_cast %46 : vector<2x2048xf32> to vector<1x2x2048xf32>
    tpu.vector_store %arg5[%c0_17, %c0_18, %c0_19], %49 {strides = array<i32>} : memref<1x2x2048xf32, #tpu.memory_space<vmem>>, vector<1x2x2048xf32>,
    return
  }
  func.func @transform_0(%arg0: i32, %arg1: i32) -> (i32, i32) {
    %c0_i32 = arith.constant 0 : i32
    %c0_i32_0 = arith.constant 0 : i32
    %c0_i32_1 = arith.constant 0 : i32
    return %c0_i32, %c0_i32_0 : i32, i32
  }
  func.func @transform_1(%arg0: i32, %arg1: i32) -> i32 {
    %c0_i32 = arith.constant 0 : i32
    %c0_i32_0 = arith.constant 0 : i32
    return %c0_i32 : i32
  }
  func.func @transform_2(%arg0: i32, %arg1: i32) -> (i32, i32, i32) {
    %c0_i32 = arith.constant 0 : i32
    %c0_i32_0 = arith.constant 0 : i32
    return %arg0, %c0_i32, %arg1 : i32, i32, i32
  }
  func.func @transform_3(%arg0: i32, %arg1: i32) -> (i32, i32, i32) {
    %c0_i32 = arith.constant 0 : i32
    %c0_i32_0 = arith.constant 0 : i32
    return %arg0, %c0_i32, %arg1 : i32, i32, i32
  }
}

</mosaic_0001>

<bundles_post_ra>
// kernel: tpu_custom_call.1
= control target key start
LH: loop header
LB: loop body
LE: loop exit
PB: predicated region body
PF: predicated region fallthrough
CT: control target
= control target key end

     0   :  { %8 = vsyncpa [#allocation5], 0  ;;  %s1705_s0 = inlined_call_operand.hbm [shape: f32[2,4], index: 0, kind: input, shape index: {}]   ;;  %s1706_s1 = inlined_call_operand.vmem [shape: f32[2], index: 1, kind: input, shape index: {}]   ;;  %s1707_s2 = inlined_call_operand.hbm [shape: f32[2,4,2048], index: 2, kind: input, shape index: {}]   ;;  %s1708_s3 = inlined_call_operand.hbm [shape: f32[2,2,2048], index: 3, kind: output, shape index: {}]  }
   0x1   :  { %9 = vsyncpa [#allocation6], 0 }
   0x2   :  { %10 = vsyncpa [#allocation3], 0 }
   0x3   :  { %12 = vsyncpa [#allocation3 + $0x1], 0 }
   0x4   :  { %13 = vsyncpa [#allocation4], 0 }
   0x5   :  { %15 = vsyncpa [#allocation4 + $0x1], 0  ;;  %s1320_s12 = smov 0   ;;  %s1322_s13 = smov 0  }
   0x6   :  { %s1324_s14 = smov 0   ;;  %s1326_s15 = smov 0  }
   0x7   :  { %s1328_s16 = smov 0   ;;  %s1330_s17 = smov 0  }
   0x8 LB: > { %s990_s18 = sadd.s32 4294967295, %s1293_s17   ;;  %s991_s19 = sadd.s32 4294967294, %s1293_s17   ;;  %s1293_s17 = sphi %s1330_s17, %s21_s17   ;;  %s1289_s16 = sphi %s1328_s16, %s1724_s16   ;;  %s1285_s15 = sphi %s1326_s15, %s1723_s15   ;;  %s1281_s14 = sphi %s1324_s14, %s1722_s14   ;;  %s1277_s13 = sphi %s1322_s13, %s1721_s13   ;;  %s1273_s12 = sphi %s1320_s12, %s1720_s12  }
   0x9   : > { %p97_p0 = scmp.ne.s32.totalorder %s1277_s13, %s1273_s12  ;;  %p1354_p1 = scmp.eq.s32.totalorder %s990_s18, 0 }
   0xa   : > { %p1358_p2 = scmp.eq.s32.totalorder %s990_s18, 1  ;;  %p129_p3 = scmp.eq.s32.totalorder %s991_s19, 1 }
   0xb   : > { %p1364_p4 = por %p1354_p1, %p97_p0  ;;  %p992_p5 = scmp.ge.s32.totalorder %s1293_s17, 1 }
   0xc   : > { %p1369_p6 = por %p129_p3, %p97_p0  ;;  %p136_p7 = scmp.lt.s32.totalorder %s1293_s17, 3 }
   0xd   : > { %s158_s27 = sshll.u32 %s1706_s1, 4  ;;  %s33_s29 = sadd.s32 1, %s1289_s16  ;;  %s159_s27 = int_to_ptr.vmem [resolvable:$true] %s158_s27 }
   0xe   : > { %s1712_s23 = scalar_select %p1369_p6, 1, 0 }
   0xf   : > { %p1374_p8 = pnand %p992_p5, %p136_p7  ;;  %p1391_p12 = scmp.ge.s32.totalorder %s33_s29, 2 }
  0x10   : > { %s1295_s4 = smov [#allocation2]   ;;  %s1162_s7 = scalar_lea.vmem %s159_s27, 16 }
  0x11   : > { %p1079_p10 = pneg %p1374_p8  ;;  %p1163_p13 = scmp.ne.s32.totalorder %s159_s27, %s1162_s7 }
  0x12   : > { %p1170_p7 = scmp.lt.s32.totalorder %s159_s27, %s159_s27 }
  0x13   : > { %p1386_p11 = pnand %p1079_p10, %p1354_p1  ;;  %p1171_p10 = scmp.lt.s32.totalorder %s1162_s7, %s1162_s7 }
  0x15   : > { %1082 = dma.hbm_to_smem (!%p1386_p11), %s1705_s0, 32, %s1295_s4, [#allocation5]  }
  0x16   : > { %p1164_p0 = pneg %p1386_p11  ;;  %p1172_p9 = por %p1171_p10, %p1170_p7 }
  0x18   : > { %p1165_p3 = pnand %p1164_p0, %p1163_p13 }
  0x1a   : > { %p1166_p5 = pneg %p1165_p3 }
  0x1c   : > { %p1173_p6 = pnand %p1172_p9, %p1166_p5 }
  0x1e   : > { %1176 = shalt.err (!%p1173_p6)
}
  0x1f   : > { %s1296_s8 = smov [#allocation7]   ;;  %s1726_s29 = smov (%p1391_p12, %s33_s29), 0 }
  0x20   : > { %1085 = dma.vmem_to_smem (!%p1386_p11), %s159_s27, 16, %s1296_s8, [#allocation6]  }
  0x21   : > { %s84_s9 = sadd.s32 1, %s1281_s14  ;;  %p91_p6 = scmp.ne.s32.totalorder %s1281_s14, %s1277_s13 }
  0x22   : > { %s79_s10 = ssub.s32 %s1289_s16, %s1726_s29  ;;  %p92_p9 = scmp.eq.s32.totalorder %s1293_s17, 0 }
  0x23   : > { %p82_p13 = scmp.eq.s32.totalorder %s79_s10, 0  ;;  %p1416_p0 = por %p1358_p2, %p91_p6 }
  0x24   : > { %p93_p3 = por %p92_p9, %p91_p6  ;;  %p1096_p5 = scmp.lt.s32.totalorder %s1293_s17, 2 }
  0x25   : > { %s1422_s18 = scalar_select %p82_p13, %s1281_s14, %s84_s9  }
  0x26   : > { %s169_s19 = sand.u32 1, %s1281_s14   ;;  %s1065_s25 = sshll.u32 %s1289_s16, 10 }
  0x27   : > { %s996_s26 = sshll.u32 %s169_s19, 6  ;;  %s181_s30 = scalar_lea.hbm %s1707_s2, %s1065_s25 }
  0x28   : > { %s173_s4 = scalar_lea.vmem [#allocation8], %s996_s26  ;;  %p1429_p11 = pnand %p1096_p5, %p93_p3 }
  0x29   : > { %s183_s5 = sshll.u32 %s173_s4, 4  ;;  %s170_s21 = scalar_lea.sflag [#allocation3], %s169_s19  ;;  %s184_s5 = int_to_ptr.vmem [resolvable:$true] %s183_s5 }
  0x2a   : > { %p1179_p2 = pneg %p1429_p11  ;;  %s1190_s7 = scalar_lea.vmem %s184_s5, 1024 }
  0x2b   : > { %p1191_p12 = scmp.ne.s32.totalorder %s184_s5, %s1190_s7  ;;  %s1297_s8 = smov [#allocation8]  }
  0x2c   : > { %s1195_s9 = sshll.u32 %s1297_s8, 4  ;;  %s1196_s9 = int_to_ptr.vmem [resolvable:$false] %s1195_s9 }
  0x2d   : > { %p1193_p7 = pnand %p1191_p12, %p1179_p2  ;;  %s1197_s10 = scalar_lea.vmem %s1196_s9, 2048 }
  0x2e   : > { %p1198_p6 = scmp.lt.s32.totalorder %s184_s5, %s1196_s9  ;;  %p1199_p9 = scmp.lt.s32.totalorder %s1197_s10, %s1190_s7 }
  0x2f   : > { %p1194_p10 = pneg %p1193_p7 }
  0x30   : > { %p1200_p13 = por %p1199_p9, %p1198_p6 }
  0x32   : > { %p1201_p3 = pnand %p1200_p13, %p1194_p10 }
  0x34   : > { %1204 = shalt.err (!%p1201_p3)
}
  0x35   : > { %1089 = dma.hbm_to_vmem [thread:$0]  (!%p1429_p11), %s181_s30, 1024, %s184_s5, %s170_s21  }
  0x36   : > { %192 = sbr.rel (%p1374_p8) target bundleno = 161 (0xa1), region = 32 }
  0x3b   : > { %1256 = dma.done.wait (%p1354_p1), [#allocation5], 32  }
  0x3c   : > { %1258 = vsyncadd (%p1354_p1), [#allocation5], 4294967264 }
  0x3d   : > { %1260 = dma.done.wait (%p1354_p1), [#allocation6], 16  }
  0x3e   : > { %1262 = vsyncadd (%p1354_p1), [#allocation6], 4294967280  ;;  %s1448_s19 = sand.u32 1, %s1277_s13  }
  0x3f   : > { %s1002_s24 = sshll.u32 %s1448_s19, 6  ;;  %s203_s25 = scalar_lea.sflag [#allocation3], %s1448_s19 }
  0x40   : > { %s1452_s26 = scalar_lea.vmem [#allocation8], %s1002_s24 }
  0x41   : > { %1264 = dma.done.wait (%p1364_p4), %s203_s25, 1024  }
  0x42   : > { %1266 = vsyncadd (%p1364_p4), %s203_s25, 4294966272 }
  0x43   : > { %211 = sfence }
  0x44   : > { %s240_s27 = sld [smem:[#allocation2]]  ;;  %v588_v0 = vlaneseq  ;;  %v1298_v2 = vmov 1983009808   ;;  %v232_v5 = vld [vmem:[%s1452_s26] sm:$0xff]  ;;  %v233_v6 = vld [vmem:[%s1452_s26 + $0x8] sm:$0xff]  ;;  %v1475_v11 = vld [vmem:[%s1452_s26 + $0x10] sm:$0xff] }
  0x45   : > { %s1004_s20 = sld [smem:[#allocation2 + $0x1]]  ;;  %v792_v3 = vunpack.c.l.s4 %v1298_v2  ;;  %v1482_v15 = vld [vmem:[%s1452_s26 + $0x18] sm:$0xff]  ;;  %vm756_vm0 = vcmask 1040384   ;;  %s1003_s8 = sshll.u32 %s1448_s19, 5 }
  0x46   : > { %s1013_s28 = sld [smem:[#allocation2 + $0x2]]  ;;  %v589_v1 = vshrl.u32 %v588_v0, 7  ;;  %s1575_s9 = scalar_lea.vmem [#allocation9], %s1003_s8 }
  0x47   : > { %s1022_s30 = sld [smem:[#allocation2 + $0x3]]  ;;  %v793_v4 = vunpack.c.0.s8 %v792_v3  ;;  %s1066_s10 = sshll.u32 %s1285_s15, 9 }
  0x48   : > { %s1458_s4 = sld [smem:[#allocation7]]  ;;  %v1468_v8 = vsub.s32 0, %v589_v1  ;;  %v1470_v9 = vsub.s32 4, %v589_v1  ;;  %s882_s24 = sshll.u32 %s1575_s9, 4  ;;  %s883_s24 = int_to_ptr.vmem [resolvable:$true] %s882_s24 }
  0x49   : > { %s1462_s22 = sld [smem:[#allocation2 + $0x80]]  ;;  %v1472_v10 = vsub.s32 %v793_v4, %v589_v1 }
  0x4a   : > { %v1464_v7 = vstv %s240_s27  ;;  %s1466_s5 = sld [smem:[#allocation2 + $0x81]]  ;;  %s880_s27 = scalar_lea.hbm %s1708_s3, %s1066_s10 }
  0x4b   : > { %v242_v12 = vmul.f32 %v1464_v7, %v232_v5  ;;  %v243_v13 = vmul.f32 %v1464_v7, %v233_v6  ;;  %v1479_v14 = vstv %s1004_s20  ;;  %s1041_s6 = sld [smem:[#allocation2 + $0x82]]  ;;  %v244_v16 = vmul.f32 %v1464_v7, %v1475_v11  ;;  %s866_s20 = scalar_lea.sflag [#allocation4], %s1448_s19 }
  0x4c   : > { %v252_v17 = vmul.f32 %v1479_v14, %v232_v5  ;;  %v253_v18 = vmul.f32 %v1479_v14, %v233_v6  ;;  %v1488_v19 = vstv %s1013_s28  ;;  %s1050_s21 = sld [smem:[#allocation2 + $0x83]]  ;;  %v245_v20 = vmul.f32 %v1464_v7, %v1482_v15  ;;  %s1205_s28 = scalar_lea.vmem %s883_s24, 512 }
  0x4d   : > { %v302_v21 = vmul.f32 %v1488_v19, %v232_v5  ;;  %v303_v22 = vmul.f32 %v1488_v19, %v233_v6  ;;  %v1494_v23 = vstv %s1022_s30  ;;  %s1059_s7 = sld [smem:[#allocation7 + $0x1]]  ;;  %v254_v24 = vmul.f32 %v1479_v14, %v1475_v11  ;;  %p1206_p1 = scmp.ne.s32.totalorder %s883_s24, %s1205_s28 }
  0x4e   : > { %v1005_v25 = vrot.slane %v252_v17, 9  ;;  %v1006_v26 = vrot.slane %v253_v18, 9  ;;  %v352_v27 = vmul.f32 %v1494_v23, %v232_v5  ;;  %v353_v28 = vmul.f32 %v1494_v23, %v233_v6  ;;  %s1299_s30 = smov [#allocation9]  }
  0x4f   : > { %v1014_v29 = vrot.slane %v302_v21, 10  ;;  %v1015_v30 = vrot.slane %v303_v22, 10  ;;  %v1501_v31 = vstv %s1458_s4  ;;  %v1504_v32 = vstv %s1462_s22  ;;  %p1207_p4 = pnand %p1206_p1, %p1416_p0  ;;  %s1209_s4 = sshll.u32 %s1299_s30, 4  ;;  %s1210_s4 = int_to_ptr.vmem [resolvable:$false] %s1209_s4 }
  0x50   : > { %v292_v33 = vadd.f32 %v1005_v25, %v242_v12  ;;  %v293_v34 = vadd.f32 %v1006_v26, %v243_v13  ;;  %v1023_v35 = vrot.slane %v352_v27, 11  ;;  %v1024_v36 = vrot.slane %v353_v28, 11  ;;  %s1211_s15 = scalar_lea.vmem %s1210_s4, 1024  ;;  %p1212_p5 = scmp.lt.s32.totalorder %s883_s24, %s1210_s4 }
  0x51   : > { %v412_v37 = vmul.f32 %v1504_v32, %v232_v5  ;;  %v413_v38 = vmul.f32 %v1504_v32, %v233_v6  ;;  %v1509_v39 = vstv %s1466_s5  ;;  %v1511_v40 = vstv %s1041_s6  ;;  %p1208_p8 = pneg %p1207_p4  ;;  %p1213_p11 = scmp.lt.s32.totalorder %s1211_s15, %s1205_s28 }
  0x52   : > { %v342_v41 = vadd.f32 %v1014_v29, %v292_v33  ;;  %v343_v42 = vadd.f32 %v1015_v30, %v293_v34  ;;  %v422_v43 = vmul.f32 %v1509_v39, %v232_v5  ;;  %v423_v44 = vmul.f32 %v1509_v39, %v233_v6 }
  0x53   : > { %v472_v45 = vmul.f32 %v1511_v40, %v232_v5  ;;  %v473_v46 = vmul.f32 %v1511_v40, %v233_v6  ;;  %v1517_v47 = vstv %s1050_s21  ;;  %v1519_v48 = vstv %s1059_s7  ;;  %p1214_p2 = por %p1213_p11, %p1212_p5 }
  0x54   : > { %v392_v49 = vadd.f32 %v1023_v35, %v342_v41  ;;  %v393_v50 = vadd.f32 %v1024_v36, %v343_v42  ;;  %v1033_v51 = vrot.slane %v422_v43, 9  ;;  %v1034_v52 = vrot.slane %v423_v44, 9 }
  0x55   : > { %v1042_v53 = vrot.slane %v472_v45, 10  ;;  %v1043_v54 = vrot.slane %v473_v46, 10  ;;  %v522_v55 = vmul.f32 %v1517_v47, %v232_v5  ;;  %v523_v56 = vmul.f32 %v1517_v47, %v233_v6  ;;  %p1215_p12 = pnand %p1214_p2, %p1208_p8 }
  0x56   : > { %v402_v57 = vadd.f32 %v1501_v31, %v392_v49  ;;  %v403_v58 = vadd.f32 %v1501_v31, %v393_v50  ;;  %v462_v59 = vadd.f32 %v1033_v51, %v412_v37  ;;  %v463_v60 = vadd.f32 %v1034_v52, %v413_v38 }
  0x57   : > { %v1051_v61 = vrot.slane %v522_v55, 11  ;;  %v1052_v62 = vrot.slane %v523_v56, 11  ;;  %v255_v63 = vmul.f32 %v1479_v14, %v1482_v15  ;;  %v1007_v0 = vrot.slane %v254_v24, 9 }
  0x58   : > { %v512_v1 = vadd.f32 %v1042_v53, %v462_v59  ;;  %v513_v2 = vadd.f32 %v1043_v54, %v463_v60  ;;  %v591_v3 = vrot.slane %v402_v57, %v1468_v8  ;;  %v595_v4 = vrot.slane %v402_v57, %v1470_v9 }
  0x59   : > { %v599_v5 = vrot.slane %v403_v58, %v1468_v8  ;;  %v603_v6 = vrot.slane %v403_v58, %v1470_v9  ;;  %v1008_v12 = vrot.slane %v255_v63, 9  ;;  %v294_v13 = vadd.f32 %v1007_v0, %v244_v16 }
  0x5a   : > { %v562_v17 = vadd.f32 %v1051_v61, %v512_v1  ;;  %v563_v18 = vadd.f32 %v1052_v62, %v513_v2  ;;  %v304_v21 = vmul.f32 %v1488_v19, %v1475_v11  ;;  %v305_v22 = vmul.f32 %v1488_v19, %v1482_v15 }
  0x5b   : > { %v295_v24 = vadd.f32 %v1008_v12, %v245_v20  ;;  %v354_v25 = vmul.f32 %v1494_v23, %v1475_v11  ;;  %v355_v26 = vmul.f32 %v1494_v23, %v1482_v15  ;;  %v414_v27 = vmul.f32 %v1504_v32, %v1475_v11 }
  0x5c   : > { %v572_v16 = vadd.f32 %v1519_v48, %v562_v17  ;;  %v573_v28 = vadd.f32 %v1519_v48, %v563_v18  ;;  %v1016_v29 = vrot.slane %v304_v21, 10  ;;  %v1017_v30 = vrot.slane %v305_v22, 10  ;;  %v237_v17 = vld [vmem:[%s1452_s26 + $0x28] sm:$0xff] }
  0x5d   : > { %v1025_v33 = vrot.slane %v354_v25, 11  ;;  %v1026_v34 = vrot.slane %v355_v26, 11  ;;  %v415_v20 = vmul.f32 %v1504_v32, %v1482_v15  ;;  %v424_v35 = vmul.f32 %v1509_v39, %v1475_v11 }
  0x5e   : > { %v679_v36 = vrot.slane %v572_v16, %v1468_v8  ;;  %v683_v37 = vrot.slane %v572_v16, %v1470_v9  ;;  %v687_v38 = vrot.slane %v573_v28, %v1468_v8  ;;  %v691_v41 = vrot.slane %v573_v28, %v1470_v9 }
  0x5f   : > { %v344_v42 = vadd.f32 %v1016_v29, %v294_v13  ;;  %v345_v43 = vadd.f32 %v1017_v30, %v295_v24  ;;  %v425_v44 = vmul.f32 %v1509_v39, %v1482_v15  ;;  %v1035_v45 = vrot.slane %v424_v35, 9  ;;  %v236_v13 = vld [vmem:[%s1452_s26 + $0x20] sm:$0xff] }
  0x60   : > { %v757_v46 = vsel %vm756_vm0, %v591_v3, %v679_v36  ;;  %v758_v49 = vsel %vm756_vm0, %v595_v4, %v683_v37  ;;  %v759_v50 = vsel %vm756_vm0, %v599_v5, %v687_v38  ;;  %v760_v51 = vsel %vm756_vm0, %v603_v6, %v691_v41 }
  0x61   : > { %v789_v52 = vcombine.low %v757_v46, %v758_v49  ;;  %v790_v53 = vcombine.low %v759_v50, %v760_v51  ;;  %v394_v54 = vadd.f32 %v1025_v33, %v344_v42  ;;  %v395_v55 = vadd.f32 %v1026_v34, %v345_v43 }
  0x62   : > { %v1036_v56 = vrot.slane %v425_v44, 9  ;;  %v464_v57 = vadd.f32 %v1035_v45, %v414_v27  ;;  %v474_v58 = vmul.f32 %v1511_v40, %v1475_v11  ;;  %v475_v59 = vmul.f32 %v1511_v40, %v1482_v15 }
  0x63   : > { %v797_v60 = vrot.slane %v789_v52, %v1472_v10  ;;  %v804_v61 = vrot.slane %v790_v53, %v1472_v10  ;;  %v404_v62 = vadd.f32 %v1501_v31, %v394_v54  ;;  %v405_v63 = vadd.f32 %v1501_v31, %v395_v55 }
  0x64   : > { %v465_v0 = vadd.f32 %v1036_v56, %v415_v20  ;;  %v1044_v1 = vrot.slane %v474_v58, 10  ;;  %v1045_v2 = vrot.slane %v475_v59, 10  ;;  %v524_v3 = vmul.f32 %v1517_v47, %v1475_v11 }
  0x65   : > { %v805_v4 = vcombine.low %v797_v60, %v804_v61  ;;  %v525_v5 = vmul.f32 %v1517_v47, %v1482_v15  ;;  %v607_v6 = vrot.slane %v404_v62, %v1468_v8  ;;  %v611_v12 = vrot.slane %v404_v62, %v1470_v9 }
  0x66   : > { %v514_v18 = vadd.f32 %v1044_v1, %v464_v57  ;;  %v515_v21 = vadd.f32 %v1045_v2, %v465_v0  ;;  %v1053_v22 = vrot.slane %v524_v3, 11  ;;  %v615_v24 = vrot.slane %v405_v63, %v1468_v8 }
  0x67   : > { %861 = vst [vmem:[%s1575_s9] sm:$0xff] %v805_v4  ;;  %v1054_v11 = vrot.slane %v525_v5, 11  ;;  %v619_v25 = vrot.slane %v405_v63, %v1470_v9  ;;  %v246_v15 = vmul.f32 %v1464_v7, %v236_v13  ;;  %v247_v26 = vmul.f32 %v1464_v7, %v237_v17 }
  0x68   : > { %v564_v27 = vadd.f32 %v1053_v22, %v514_v18  ;;  %v256_v16 = vmul.f32 %v1479_v14, %v236_v13  ;;  %v257_v28 = vmul.f32 %v1479_v14, %v237_v17  ;;  %v306_v29 = vmul.f32 %v1488_v19, %v236_v13 }
  0x69   : > { %v565_v30 = vadd.f32 %v1054_v11, %v515_v21  ;;  %v307_v33 = vmul.f32 %v1488_v19, %v237_v17  ;;  %v356_v34 = vmul.f32 %v1494_v23, %v236_v13  ;;  %v357_v20 = vmul.f32 %v1494_v23, %v237_v17 }
  0x6a   : > { %v574_v35 = vadd.f32 %v1519_v48, %v564_v27  ;;  %v1009_v36 = vrot.slane %v256_v16, 9  ;;  %v1010_v37 = vrot.slane %v257_v28, 9  ;;  %v1018_v38 = vrot.slane %v306_v29, 10  ;;  %v238_v28 = vld [vmem:[%s1452_s26 + $0x30] sm:$0xff]  ;;  %v239_v29 = vld [vmem:[%s1452_s26 + $0x38] sm:$0xff] }
  0x6b   : > { %v575_v41 = vadd.f32 %v1519_v48, %v565_v30  ;;  %v1019_v42 = vrot.slane %v307_v33, 10  ;;  %v1027_v43 = vrot.slane %v356_v34, 11  ;;  %v1028_v44 = vrot.slane %v357_v20, 11 }
  0x6c   : > { %v695_v45 = vrot.slane %v574_v35, %v1468_v8  ;;  %v699_v46 = vrot.slane %v574_v35, %v1470_v9  ;;  %v296_v49 = vadd.f32 %v1009_v36, %v246_v15  ;;  %v297_v50 = vadd.f32 %v1010_v37, %v247_v26 }
  0x6d   : > { %v703_v51 = vrot.slane %v575_v41, %v1468_v8  ;;  %v707_v52 = vrot.slane %v575_v41, %v1470_v9  ;;  %v416_v53 = vmul.f32 %v1504_v32, %v236_v13  ;;  %v417_v54 = vmul.f32 %v1504_v32, %v237_v17 }
  0x6e   : > { %v761_v55 = vsel %vm756_vm0, %v607_v6, %v695_v45  ;;  %v762_v56 = vsel %vm756_vm0, %v611_v12, %v699_v46  ;;  %v346_v57 = vadd.f32 %v1018_v38, %v296_v49  ;;  %v347_v58 = vadd.f32 %v1019_v42, %v297_v50 }
  0x6f   : > { %v763_v59 = vsel %vm756_vm0, %v615_v24, %v703_v51  ;;  %v764_v60 = vsel %vm756_vm0, %v619_v25, %v707_v52  ;;  %v806_v61 = vcombine.low %v761_v55, %v762_v56  ;;  %v426_v62 = vmul.f32 %v1509_v39, %v236_v13 }
  0x70   : > { %v807_v63 = vcombine.low %v763_v59, %v764_v60  ;;  %v396_v0 = vadd.f32 %v1027_v43, %v346_v57  ;;  %v397_v1 = vadd.f32 %v1028_v44, %v347_v58  ;;  %v427_v2 = vmul.f32 %v1509_v39, %v237_v17 }
  0x71   : > { %v814_v3 = vrot.slane %v806_v61, %v1472_v10  ;;  %v1037_v4 = vrot.slane %v426_v62, 9  ;;  %v476_v5 = vmul.f32 %v1511_v40, %v236_v13  ;;  %v477_v6 = vmul.f32 %v1511_v40, %v237_v17 }
  0x72   : > { %v821_v12 = vrot.slane %v807_v63, %v1472_v10  ;;  %v406_v18 = vadd.f32 %v1501_v31, %v396_v0  ;;  %v407_v21 = vadd.f32 %v1501_v31, %v397_v1  ;;  %v1038_v22 = vrot.slane %v427_v2, 9 }
  0x73   : > { %v466_v24 = vadd.f32 %v1037_v4, %v416_v53  ;;  %v1046_v11 = vrot.slane %v476_v5, 10  ;;  %v1047_v25 = vrot.slane %v477_v6, 10  ;;  %v526_v15 = vmul.f32 %v1517_v47, %v236_v13 }
  0x74   : > { %v822_v26 = vcombine.low %v814_v3, %v821_v12  ;;  %v467_v27 = vadd.f32 %v1038_v22, %v417_v54  ;;  %v527_v16 = vmul.f32 %v1517_v47, %v237_v17  ;;  %v623_v34 = vrot.slane %v406_v18, %v1468_v8 }
  0x75   : > { %v516_v30 = vadd.f32 %v1046_v11, %v466_v24  ;;  %v1055_v33 = vrot.slane %v526_v15, 11  ;;  %v627_v20 = vrot.slane %v406_v18, %v1470_v9  ;;  %v631_v37 = vrot.slane %v407_v21, %v1468_v8 }
  0x76   : > { %862 = vst [vmem:[%s1575_s9 + $0x8] sm:$0xff] %v822_v26  ;;  %v517_v35 = vadd.f32 %v1047_v25, %v467_v27  ;;  %v1056_v36 = vrot.slane %v527_v16, 11  ;;  %v248_v38 = vmul.f32 %v1464_v7, %v238_v28  ;;  %v249_v41 = vmul.f32 %v1464_v7, %v239_v29 }
  0x77   : > { %v566_v13 = vadd.f32 %v1055_v33, %v516_v30  ;;  %v258_v17 = vmul.f32 %v1479_v14, %v238_v28  ;;  %v259_v42 = vmul.f32 %v1479_v14, %v239_v29  ;;  %v308_v44 = vmul.f32 %v1488_v19, %v238_v28 }
  0x78   : > { %v567_v43 = vadd.f32 %v1056_v36, %v517_v35  ;;  %v309_v45 = vmul.f32 %v1488_v19, %v239_v29  ;;  %v358_v46 = vmul.f32 %v1494_v23, %v238_v28  ;;  %v359_v52 = vmul.f32 %v1494_v23, %v239_v29 }
  0x79   : > { %v576_v49 = vadd.f32 %v1519_v48, %v566_v13  ;;  %v1011_v50 = vrot.slane %v258_v17, 9  ;;  %v1012_v51 = vrot.slane %v259_v42, 9  ;;  %v635_v7 = vrot.slane %v407_v21, %v1470_v9 }
  0x7a   : > { %v577_v53 = vadd.f32 %v1519_v48, %v567_v43  ;;  %v1020_v54 = vrot.slane %v308_v44, 10  ;;  %v1021_v55 = vrot.slane %v309_v45, 10  ;;  %v1029_v60 = vrot.slane %v358_v46, 11 }
  0x7b   : > { %v711_v14 = vrot.slane %v576_v49, %v1468_v8  ;;  %v715_v56 = vrot.slane %v576_v49, %v1470_v9  ;;  %v298_v57 = vadd.f32 %v1011_v50, %v248_v38  ;;  %v299_v19 = vadd.f32 %v1012_v51, %v249_v41 }
  0x7c   : > { %v719_v58 = vrot.slane %v577_v53, %v1468_v8  ;;  %v723_v59 = vrot.slane %v577_v53, %v1470_v9  ;;  %v1030_v61 = vrot.slane %v359_v52, 11  ;;  %v418_v5 = vmul.f32 %v1504_v32, %v238_v28 }
  0x7d   : > { %v765_v23 = vsel %vm756_vm0, %v623_v34, %v711_v14  ;;  %v766_v62 = vsel %vm756_vm0, %v627_v20, %v715_v56  ;;  %v348_v63 = vadd.f32 %v1020_v54, %v298_v57  ;;  %v349_v0 = vadd.f32 %v1021_v55, %v299_v19 }
  0x7e   : > { %v767_v1 = vsel %vm756_vm0, %v631_v37, %v719_v58  ;;  %v768_v2 = vsel %vm756_vm0, %v635_v7, %v723_v59  ;;  %v823_v3 = vcombine.low %v765_v23, %v766_v62  ;;  %v419_v6 = vmul.f32 %v1504_v32, %v239_v29 }
  0x7f   : > { %v824_v4 = vcombine.low %v767_v1, %v768_v2  ;;  %v428_v12 = vmul.f32 %v1509_v39, %v238_v28  ;;  %v429_v21 = vmul.f32 %v1509_v39, %v239_v29  ;;  %v478_v22 = vmul.f32 %v1511_v40, %v238_v28 }
  0x80   : > { %v831_v18 = vrot.slane %v823_v3, %v1472_v10  ;;  %v479_v24 = vmul.f32 %v1511_v40, %v239_v29  ;;  %v398_v25 = vadd.f32 %v1029_v60, %v348_v63  ;;  %v399_v15 = vadd.f32 %v1030_v61, %v349_v0 }
  0x81   : > { %v838_v11 = vrot.slane %v824_v4, %v1472_v10  ;;  %v1039_v26 = vrot.slane %v428_v12, 9  ;;  %v1040_v27 = vrot.slane %v429_v21, 9  ;;  %v1048_v16 = vrot.slane %v478_v22, 10 }
  0x82   : > { %v1049_v30 = vrot.slane %v479_v24, 10  ;;  %v528_v32 = vmul.f32 %v1517_v47, %v238_v28  ;;  %v529_v20 = vmul.f32 %v1517_v47, %v239_v29  ;;  %v408_v36 = vadd.f32 %v1501_v31, %v398_v25 }
  0x83   : > { %v839_v33 = vcombine.low %v831_v18, %v838_v11  ;;  %v468_v34 = vadd.f32 %v1039_v26, %v418_v5  ;;  %v469_v39 = vadd.f32 %v1040_v27, %v419_v6  ;;  %v409_v38 = vadd.f32 %v1501_v31, %v399_v15 }
  0x84   : > { %v1057_v35 = vrot.slane %v528_v32, 11  ;;  %v1058_v37 = vrot.slane %v529_v20, 11  ;;  %v639_v28 = vrot.slane %v408_v36, %v1468_v8  ;;  %v643_v43 = vrot.slane %v408_v36, %v1470_v9 }
  0x85   : > { %863 = vst [vmem:[%s1575_s9 + $0x10] sm:$0xff] %v839_v33  ;;  %v518_v40 = vadd.f32 %v1048_v16, %v468_v34  ;;  %v519_v13 = vadd.f32 %v1049_v30, %v469_v39  ;;  %v647_v29 = vrot.slane %v409_v38, %v1468_v8  ;;  %v651_v44 = vrot.slane %v409_v38, %v1470_v9 }
  0x87   : > { %v568_v41 = vadd.f32 %v1057_v35, %v518_v40  ;;  %v569_v17 = vadd.f32 %v1058_v37, %v519_v13 }
  0x89   : > { %v578_v42 = vadd.f32 %v1519_v48, %v568_v41  ;;  %v579_v47 = vadd.f32 %v1519_v48, %v569_v17 }
  0x8b   : > { %v727_v45 = vrot.slane %v578_v42, %v1468_v8  ;;  %v731_v31 = vrot.slane %v578_v42, %v1470_v9  ;;  %v735_v46 = vrot.slane %v579_v47, %v1468_v8  ;;  %v739_v49 = vrot.slane %v579_v47, %v1470_v9 }
  0x8d   : > { %v769_v50 = vsel %vm756_vm0, %v639_v28, %v727_v45  ;;  %v770_v51 = vsel %vm756_vm0, %v643_v43, %v731_v31  ;;  %v771_v48 = vsel %vm756_vm0, %v647_v29, %v735_v46  ;;  %v772_v52 = vsel %vm756_vm0, %v651_v44, %v739_v49 }
  0x8e   : > { %v840_v53 = vcombine.low %v769_v50, %v770_v51  ;;  %v841_v7 = vcombine.low %v771_v48, %v772_v52 }
  0x90   : > { %v848_v54 = vrot.slane %v840_v53, %v1472_v10  ;;  %v855_v8 = vrot.slane %v841_v7, %v1472_v10 }
  0x92   : > { %v856_v55 = vcombine.low %v848_v54, %v855_v8 }
  0x94   : > { %864 = vst [vmem:[%s1575_s9 + $0x18] sm:$0xff] %v856_v55 }
  0x95   : > { %1218 = shalt.err (!%p1215_p12)
}
  0x96   : > { %s1219_s22 = scalar_lea.hbm %s880_s27, 512  ;;  %s1223_s6 = scalar_lea.hbm %s1708_s3, 1024 }
  0x97   : > { %p1220_p7 = scmp.ne.s32.totalorder %s880_s27, %s1219_s22  ;;  %p1224_p9 = scmp.lt.s32.totalorder %s880_s27, %s1708_s3 }
  0x98   : > { %p1225_p13 = scmp.lt.s32.totalorder %s1223_s6, %s1219_s22 }
  0x99   : > { %p1221_p10 = pnand %p1220_p7, %p1416_p0 }
  0x9a   : > { %p1226_p3 = por %p1225_p13, %p1224_p9 }
  0x9b   : > { %p1222_p6 = pneg %p1221_p10 }
  0x9d   : > { %p1227_p1 = pnand %p1226_p3, %p1222_p6 }
  0x9f   : > { %1230 = shalt.err (!%p1227_p1)
}
  0xa0   : > { %1077 = dma.vmem_to_hbm [thread:$0]  (%p1416_p0), %s883_s24, 512, %s880_s27, %s866_s20  }
  0xa1 PF: > { %s894_s8 = sand.u32 1, %s1273_s12   ;;  %p1718_p4 = scmp.ne.s32.totalorder %s1712_s23, 0 }
  0xa2   : > { %p1719_p8 = scmp.ge.s32.totalorder %s1293_s17, 2  ;;  %s895_s9 = scalar_lea.sflag [#allocation4], %s894_s8 }
  0xa4   : > { %p1091_p5 = pnand %p1719_p8, %p1718_p4 }
  0xa6   : > { %p1092_p11 = pneg %p1091_p5 }
  0xa8   : > { %1268 = dma.done.wait (%p1092_p11), %s895_s9, 512  }
  0xa9   : > { %1270 = vsyncadd (%p1092_p11), %s895_s9, 4294966784  ;;  %s21_s17 = sadd.s32 1, %s1293_s17   ;;  %s1720_s12 = smov %s1277_s13 }
  0xaa   : > { %p18_p2 = scmp.ge.s32.totalorder %s21_s17, 4   ;;  %s1721_s13 = smov %s1281_s14 }
  0xab   : > { %s1722_s14 = smov %s1422_s18  ;;  %s1723_s15 = smov %s1289_s16 }
  0xac   : > { %s1724_s16 = smov %s1726_s29  ;;  %20 = sbr.rel (!%p18_p2) target bundleno = 8 (0x8), region = 87 }
  0xb1   :  { %900 = vsyncpa [#allocation3], 1 }
  0xb2   :  { %902 = vsyncpa [#allocation3 + $0x1], 1 }
  0xb3   :  { %903 = vsyncpa [#allocation4], 1 }
  0xb4   :  { %905 = vsyncpa [#allocation4 + $0x1], 1 }
  0xb5   :  { %906 = vsyncpa [#allocation5], 1 }
  0xb6   :  { %908 = vsyncpa [#allocation5 + $0x1], 1 }
  0xb7   :  { %909 = vsyncpa [#allocation6], 1 }
  0xb8   :  { %911 = vsyncpa [#allocation6 + $0x1], 1 }

</bundles_post_ra>
